<compile_context>
chip_gen: v5e
topology: v5e:2x2
jax: 0.10.0
libtpu: 0.0.40
codegen_flags: <defaults>
</compile_context>

<pallas_src>
import functools
import math

import jax
import jax.numpy as jnp
from jax.experimental import pallas as pl
from jax.experimental.pallas import tpu as pltpu

NEG_SLOPE = 0.01      # nn.LeakyReLU() default negative slope
LANE = 128
SUBLANE = 8


def _round_up(x, m):
    return ((x + m - 1) // m) * m


# ---------------------------------------------------------------------------
# Core Pallas kernel: conv-as-matmul, taps folded into K, fused epilogue.
# ---------------------------------------------------------------------------
def _conv_matmul_kernel(t_ref, w_ref, b_ref, o_ref, *, act):
    # t_ref: (TM, K_pad)        bf16  im2col rows for this tile
    # w_ref: (K_pad, Cout_pad)  bf16  whole folded weight (VMEM resident)
    # b_ref: (1, Cout_pad)      f32   bias
    # o_ref: (TM, Cout_pad)     f32   lane-dense output tile
    y = jnp.dot(t_ref[...], w_ref[...], preferred_element_type=jnp.float32)
    y = y + b_ref[...]
    if act == "leaky":
        y = jnp.where(y > 0, y, NEG_SLOPE * y)
    elif act == "relu":
        y = jnp.maximum(y, 0.0)
    elif act == "sigmoid":
        y = jax.nn.sigmoid(y)
    o_ref[...] = y.astype(o_ref.dtype)


def _im2col(x, k, stride, padding, pad_mode):
    """NHWC -> (N*Ho*Wo, k*k*Cin) im2col rows, tap-major / channel-minor."""
    n, _, _, c = x.shape
    if padding > 0:
        mode = "reflect" if pad_mode == "reflect" else "constant"
        x = jnp.pad(x, ((0, 0), (padding, padding), (padding, padding), (0, 0)),
                    mode=mode)
    hp, wp = x.shape[1], x.shape[2]
    ho = (hp - k) // stride + 1
    wo = (wp - k) // stride + 1
    cols = []
    for kh in range(k):
        for kw in range(k):
            cols.append(jax.lax.slice(
                x, (0, kh, kw, 0),
                (n, kh + (ho - 1) * stride + 1, kw + (wo - 1) * stride + 1, c),
                (1, stride, stride, 1)))
    t = jnp.concatenate(cols, axis=-1)               # (N, Ho, Wo, k*k*C)
    return t.reshape(n * ho * wo, k * k * c), (n, ho, wo)


@functools.lru_cache(maxsize=None)
def _make_conv_fn(stride, padding, pad_mode, act, tm):
    @jax.jit
    def conv_fn(x, w, b):
        n, _, _, cin = x.shape
        cout, cin_w, kh, kw = w.shape
        assert kh == kw and cin_w == cin
        k = kh

        # --- glue: im2col (HBM materialization).
        # TODO(synk): form taps in-kernel from manually DMA'd padded row bands
        # (memory_space=pl.ANY + make_async_copy) to avoid the expanded HBM
        # write/read of the im2col activations.
        t, (nb, ho, wo) = _im2col(x, k, stride, padding, pad_mode)
        rows, kdim = t.shape

        kdim_pad = _round_up(kdim, 16)           # bf16 sublane packing for K
        cout_pad = _round_up(cout, LANE)         # lane-dense unmasked stores
        tmx = min(_round_up(tm, SUBLANE), _round_up(rows, SUBLANE))
        # keep >= 2 row tiles when there is enough work so both TensorCores
        # (v7x) / megacore halves get a share.
        if rows > SUBLANE and _round_up(rows, tmx) == tmx:
            tmx = _round_up(-(-rows // 2), SUBLANE)
        rows_pad = _round_up(rows, tmx)
        m_tiles = rows_pad // tmx

        t = jnp.pad(t, ((0, rows_pad - rows), (0, kdim_pad - kdim)))
        t = t.astype(jnp.bfloat16)
        wm = jnp.transpose(w, (2, 3, 1, 0)).reshape(k * k * cin, cout)
        wm = jnp.pad(wm, ((0, kdim_pad - kdim), (0, cout_pad - cout)))
        wm = wm.astype(jnp.bfloat16)
        bm = jnp.pad(b.astype(jnp.float32), (0, cout_pad - cout))
        bm = bm.reshape(1, cout_pad)

        # VMEM budget: double-buffered row/output tiles + (pipeliner-default
        # double-buffered) resident weight + bias; 4x headroom, capped below
        # v7x's 64 MiB per-core VMEM.
        est = (2 * tmx * kdim_pad * 2 + 2 * kdim_pad * cout_pad * 2
               + 2 * cout_pad * 4 + 2 * tmx * cout_pad * 4)
        vmem_limit = int(min(48 * 1024 * 1024, max(16 * 1024 * 1024, 4 * est)))

        cost = pl.CostEstimate(
            flops=2 * rows * kdim * cout,
            transcendentals=rows * cout if act == "sigmoid" else 0,
            bytes_accessed=(rows_pad * kdim_pad * 2 + kdim_pad * cout_pad * 2
                            + rows_pad * cout_pad * 4))

        out = pl.pallas_call(
            functools.partial(_conv_matmul_kernel, act=act),
            out_shape=jax.ShapeDtypeStruct((rows_pad, cout_pad), jnp.float32),
            grid=(m_tiles,),
            in_specs=[
                pl.BlockSpec((tmx, kdim_pad), lambda m: (m, 0)),
                pl.BlockSpec((kdim_pad, cout_pad), lambda m: (0, 0)),
                pl.BlockSpec((1, cout_pad), lambda m: (0, 0)),
            ],
            out_specs=pl.BlockSpec((tmx, cout_pad), lambda m: (m, 0)),
            compiler_params=pltpu.CompilerParams(
                dimension_semantics=("parallel",),
                vmem_limit_bytes=vmem_limit),
            cost_estimate=cost,
        )(t, wm, bm)

        # TODO(synk): for tiny Cout (1/3/8/16) the lane padding to 128 inflates
        # output HBM writes; packing (Wo, Cout) into the lane dim would fix it.
        return out[:rows, :cout].reshape(nb, ho, wo, cout)

    return conv_fn


def conv2d(x, w, b=None, *, stride=1, padding=0, pad_mode="zero",
           act="linear", tm=2048):
    """Conv2d(+bias)(+activation); NHWC activations, OIHW weights (Pallas)."""
    if b is None:
        b = jnp.zeros((w.shape[0],), jnp.float32)
    return _make_conv_fn(int(stride), int(padding), str(pad_mode), str(act),
                         int(tm))(x, w, b)


def conv2d_ref(x, w, b=None, *, stride=1, padding=0, pad_mode="zero",
               act="linear", tm=None):
    """Pure-JAX f32 reference conv with identical semantics (for self-check)."""
    del tm
    if padding > 0:
        mode = "reflect" if pad_mode == "reflect" else "constant"
        x = jnp.pad(x, ((0, 0), (padding, padding), (padding, padding), (0, 0)),
                    mode=mode)
    y = jax.lax.conv_general_dilated(
        x, w, window_strides=(stride, stride), padding="VALID",
        dimension_numbers=("NHWC", "OIHW", "NHWC"),
        precision=jax.lax.Precision.HIGHEST)
    if b is not None:
        y = y + b.reshape(1, 1, 1, -1)
    if act == "leaky":
        y = jnp.where(y > 0, y, NEG_SLOPE * y)
    elif act == "relu":
        y = jnp.maximum(y, 0.0)
    elif act == "sigmoid":
        y = jax.nn.sigmoid(y)
    return y


# ---------------------------------------------------------------------------
# DeNet building blocks (NHWC; shared by the Pallas and reference paths).
# ---------------------------------------------------------------------------
def make_gauss_weight(channels=3):
    # cv2.getGaussianKernel(5, 0) -> fixed [1,4,6,4,1]/16; depthwise conv is
    # expressed as an equivalent block-diagonal dense OIHW weight.
    g1 = jnp.array([1.0, 4.0, 6.0, 4.0, 1.0], jnp.float32) / 16.0
    k2d = jnp.outer(g1, g1)
    w = jnp.zeros((channels, channels, 5, 5), jnp.float32)
    for c in range(channels):
        w = w.at[c, c].set(k2d)
    return w


def lap_conv_gauss(x, gw, conv):
    return conv(x, gw, None, stride=1, padding=2, pad_mode="reflect")


def lap_pyramid_down(x, gw, conv):
    # conv_gauss followed by [:, ::2, ::2]  ==  stride-2 gauss conv on the
    # reflect-padded input (fused; skips the intermediate full-res map).
    return conv(x, gw, None, stride=2, padding=2, pad_mode="reflect")


def lap_upsample(x, gw, conv):
    n, h, w, c = x.shape
    up = jnp.zeros((n, 2 * h, 2 * w, c), x.dtype).at[:, ::2, ::2, :].set(4.0 * x)
    return lap_conv_gauss(up, gw, conv)


def pyramid_decom(img, gw, conv, num_high):
    current = img
    pyr = []
    for _ in range(num_high):
        down = lap_pyramid_down(current, gw, conv)
        up = lap_upsample(down, gw, conv)
        pyr.append(current - up)
        current = down
    pyr.append(current)
    return pyr


def pyramid_recons(pyr, gw, conv):
    image = pyr[0]
    for level in pyr[1:]:
        image = lap_upsample(image, gw, conv) + level
    return image


def _bilinear_up2x_align_corners(x):
    # nn.Upsample(scale_factor=2, mode='bilinear', align_corners=True)
    def resize(arr, axis):
        size_in = arr.shape[axis]
        size_out = 2 * size_in
        if size_in == 1:
            return jnp.repeat(arr, 2, axis=axis)
        pos = jnp.arange(size_out, dtype=jnp.float32) * (size_in - 1) / (size_out - 1)
        lo = jnp.floor(pos).astype(jnp.int32)
        hi = jnp.minimum(lo + 1, size_in - 1)
        frac = pos - lo.astype(jnp.float32)
        a = jnp.take(arr, lo, axis=axis)
        b = jnp.take(arr, hi, axis=axis)
        shape = [1] * arr.ndim
        shape[axis] = size_out
        frac = frac.reshape(shape)
        return a * (1.0 - frac) + b * frac
    return resize(resize(x, 1), 2)


def spatial_attention(x, sa_w, conv):
    avgout = jnp.mean(x, axis=-1, keepdims=True)
    maxout = jnp.max(x, axis=-1, keepdims=True)
    att = conv(jnp.concatenate([avgout, maxout], axis=-1), sa_w, None,
               padding=1, act="sigmoid")
    return att * x


def trans_guide(x, p, conv):
    y = conv(x, p["g0"][0], p["g0"][1], padding=1, act="leaky")
    y = spatial_attention(y, p["sa"][0], conv)
    return conv(y, p["g1"][0], p["g1"][1], padding=1)


def trans_low(x, p, conv):
    x1 = conv(x, p["enc0"][0], p["enc0"][1], padding=1, act="leaky")
    x1 = conv(x1, p["enc1"][0], p["enc1"][1], padding=1, act="leaky")
    # NOTE: the PyTorch forward applies mm1 four times (mm2..mm4 unused);
    # reproduced faithfully.
    m = conv(x1, p["mm1"][0], p["mm1"][1], padding=0)
    x1 = jnp.concatenate([m, m, m, m], axis=-1)
    x1 = conv(x1, p["dec0"][0], p["dec0"][1], padding=1, act="leaky")
    x1 = conv(x1, p["dec1"][0], p["dec1"][1], padding=1)
    out = jnp.maximum(x + x1, 0.0)                       # torch.relu
    mask = trans_guide(jnp.concatenate([x, out], axis=-1), p, conv)
    return out, mask


def up_guide(x, w, conv):
    return conv(_bilinear_up2x_align_corners(x), w, None, padding=0)


def trans_high(x, guide, p, conv):
    e = conv(x, p["enc"][0], p["enc"][1], padding=1, act="leaky")
    scale = conv(guide, p["scale"][0], p["scale"][1], padding=1)
    shift = conv(guide, p["shift"][0], p["shift"][1], padding=1)
    y = e + (e * scale + shift)
    return x + conv(y, p["dec"][0], p["dec"][1], padding=1)


def denet_forward(x_nchw, params, conv, num_high=3):
    x = jnp.transpose(x_nchw, (0, 2, 3, 1))              # NHWC internally
    gw = params["gauss_w"]
    pyrs = pyramid_decom(x, gw, conv, num_high)
    low_out, guide = trans_low(pyrs[-1], params["trans_low"], conv)
    trans_pyrs = [low_out]
    for i in range(num_high):
        guide = up_guide(guide, params["up_guide"][i], conv)
        trans_pyrs.append(
            trans_high(pyrs[-2 - i], guide, params["trans_high"][i], conv))
    out = pyramid_recons(trans_pyrs, gw, conv)
    out = jnp.transpose(out, (0, 3, 1, 2))                # back to NCHW
    return out, out, out


# ---------------------------------------------------------------------------
# Deterministic parameter construction (matches DeNet default hyperparams).
# ---------------------------------------------------------------------------
def init_params(key, num_high=3, ch_blocks=32, high_ch=32, ch_mask=32):
    def conv_init(k, cout, cin, ksize, bias=True):
        kw_, kb_ = jax.random.split(k)
        fan_in = cin * ksize * ksize
        w = jax.random.normal(kw_, (cout, cin, ksize, ksize),
                              jnp.float32) / math.sqrt(fan_in)
        b = (jax.random.normal(kb_, (cout,), jnp.float32) * 0.05) if bias else None
        return w, b

    keys = iter(jax.random.split(key, 24))
    p = {"gauss_w": make_gauss_weight(3)}
    p["trans_low"] = {
        "enc0": conv_init(next(keys), 16, 3, 3),
        "enc1": conv_init(next(keys), ch_blocks, 16, 3),
        "mm1": conv_init(next(keys), ch_blocks // 4, ch_blocks, 1),
        "dec0": conv_init(next(keys), 16, ch_blocks, 3),
        "dec1": conv_init(next(keys), 3, 16, 3),
        "g0": conv_init(next(keys), ch_mask, 6, 3),
        "sa": conv_init(next(keys), 1, 2, 3, bias=False),
        "g1": conv_init(next(keys), 3, ch_mask, 3),
    }
    p["up_guide"] = [conv_init(next(keys), 3, 3, 1, bias=False)[0]
                     for _ in range(num_high)]
    p["trans_high"] = [{
        "enc": conv_init(next(keys), high_ch, 3, 3),
        "scale": conv_init(next(keys), high_ch, 3, 3),
        "shift": conv_init(next(keys), high_ch, 3, 3),
        "dec": conv_init(next(keys), 3, high_ch, 3),
    } for _ in range(num_high)]
    return p


if __name__ == "__main__":
    root = jax.random.PRNGKey(0)
    k_x, k_p = jax.random.split(root)
    x = jax.random.uniform(k_x, (2, 3, 32, 32), jnp.float32)   # image-like input
    params = init_params(k_p)

    out, out_b, out_c = denet_forward(x, params, conv=conv2d)
    out = jax.block_until_ready(out)

    ref, _, _ = denet_forward(x, params, conv=conv2d_ref)
    ref = jax.block_until_ready(ref)

    assert out.shape == x.shape and out_b.shape == x.shape and out_c.shape == x.shape
    max_err = float(jnp.max(jnp.abs(out - ref)))
    # bf16 matmul operands (f32 accumulation) through a deep conv chain.
    assert jnp.allclose(out, ref, rtol=5e-2, atol=8e-2), max_err
    print("KERNEL_OK")
</pallas_src>

<mosaic_0001>
module attributes {stable_mosaic.version = 11 : i64} {
  func.func @_conv_matmul_kernel(%arg0: i32, %arg1: memref<256x80xbf16, #tpu.memory_space<vmem>>, %arg2: memref<80x128xbf16, #tpu.memory_space<vmem>>, %arg3: memref<1x128xf32, #tpu.memory_space<vmem>>, %arg4: memref<256x128xf32, #tpu.memory_space<vmem>>) attributes {dimension_semantics = [#tpu.dimension_semantics<parallel>], iteration_bounds = array<i64: 2>, scalar_prefetch = 0 : i64, scratch_operands = 0 : i64, tpu.core_type = #tpu.core_type<tc>, window_params = [{transform_indices = @transform_0, window_bounds = array<i64: 256, 80>}, {pipeline_mode = #tpu.pipeline_mode<synchronous>, transform_indices = @transform_1, window_bounds = array<i64: 80, 128>}, {pipeline_mode = #tpu.pipeline_mode<synchronous>, transform_indices = @transform_2, window_bounds = array<i64: 1, 128>}, {transform_indices = @transform_3, window_bounds = array<i64: 256, 128>}]} {
    %c0 = arith.constant 0 : index
    %c0_0 = arith.constant 0 : index
    %0 = vector.load %arg1[%c0, %c0_0] : memref<256x80xbf16, #tpu.memory_space<vmem>>, vector<256x80xbf16>
    %c0_1 = arith.constant 0 : index
    %c0_2 = arith.constant 0 : index
    %1 = vector.load %arg2[%c0_1, %c0_2] : memref<80x128xbf16, #tpu.memory_space<vmem>>, vector<80x128xbf16>
    %cst = arith.constant dense<0.000000e+00> : vector<256x128xf32>
    %2 = tpu.matmul %0, %1, %cst {dimension_numbers = #tpu.dot_dimension_numbers<[1], [0], [0], [1], [0, 0, 1, 1], [], []>} : vector<256x80xbf16>, vector<80x128xbf16>, vector<256x128xf32> -> vector<256x128xf32>
    %c0_3 = arith.constant 0 : index
    %c0_4 = arith.constant 0 : index
    %3 = vector.load %arg3[%c0_3, %c0_4] : memref<1x128xf32, #tpu.memory_space<vmem>>, vector<1x128xf32>
    %4 = vector.broadcast %3 : vector<1x128xf32> to vector<256x128xf32>
    %5 = arith.addf %2, %4 : vector<256x128xf32>
    %c0_5 = arith.constant 0 : index
    %c0_6 = arith.constant 0 : index
    %6 = vector.load %arg4[%c0_5, %c0_6] : memref<256x128xf32, #tpu.memory_space<vmem>>, vector<256x128xf32>
    tpu.vector_store %arg4[%c0_5, %c0_6], %5 {strides = array<i32>} : memref<256x128xf32, #tpu.memory_space<vmem>>, vector<256x128xf32>,
    return
  }
  func.func @transform_0(%arg0: i32) -> (i32, i32) {
    %c0_i32 = arith.constant 0 : i32
    %c0_i32_0 = arith.constant 0 : i32
    return %arg0, %c0_i32 : i32, i32
  }
  func.func @transform_1(%arg0: i32) -> (i32, i32) {
    %c0_i32 = arith.constant 0 : i32
    %c0_i32_0 = arith.constant 0 : i32
    %c0_i32_1 = arith.constant 0 : i32
    return %c0_i32, %c0_i32_0 : i32, i32
  }
  func.func @transform_2(%arg0: i32) -> (i32, i32) {
    %c0_i32 = arith.constant 0 : i32
    %c0_i32_0 = arith.constant 0 : i32
    %c0_i32_1 = arith.constant 0 : i32
    return %c0_i32, %c0_i32_0 : i32, i32
  }
  func.func @transform_3(%arg0: i32) -> (i32, i32) {
    %c0_i32 = arith.constant 0 : i32
    %c0_i32_0 = arith.constant 0 : i32
    return %arg0, %c0_i32 : i32, i32
  }
}

</mosaic_0001>

<bundles_post_ra>
// kernel: conv_fn.1
= control target key start
LH: loop header
LB: loop body
LE: loop exit
PB: predicated region body
PF: predicated region fallthrough
CT: control target
= control target key end

     0   :  { %s741_s12 = smov 0   ;;  %s882_s0 = inlined_call_operand.vmem [shape: bf16[512,80], index: 0, kind: input, shape index: {}]   ;;  %s883_s1 = inlined_call_operand.vmem [shape: bf16[80,128], index: 1, kind: input, shape index: {}]   ;;  %s884_s2 = inlined_call_operand.vmem [shape: f32[1,128], index: 2, kind: input, shape index: {}]   ;;  %s885_s3 = inlined_call_operand.vmem [shape: f32[512,128], index: 3, kind: output, shape index: {}]  }
   0x1 LB: > { %s557_s13 = sadd.s32 4294967295, %s719_s12   ;;  %p561_p0 = scmp.ge.s32.totalorder %s719_s12, 1  ;;  %s719_s12 = sphi %s741_s12, %s13_s12  }
   0x2   : > { %p138_p1 = scmp.lt.s32.totalorder %s719_s12, 3 }
   0x4   : > { %p139_p2 = pnand %p561_p0, %p138_p1 }
   0x5   : > { %s562_s16 = sshll.u32 (!%p139_p2), %s557_s13, 5 }
   0x6   : > { %142 = sbr.rel (%p139_p2) target bundleno = 224 (0xe0), region = 32  ;;  %p163_p3 = scmp.lt.s32.totalorder (!%p139_p2), %s562_s16, 63 }
   0xb   : > { %v688_v0 = vld [vmem:[%s883_s1 + $0x20] sm:$0xff]  ;;  %v687_v1 = vld [vmem:[%s883_s1 + $0x18] sm:$0xff]  ;;  %v686_v2 = vld [vmem:[%s883_s1 + $0x10] sm:$0xff]  ;;  %s887_s16 = smov (!%p163_p3, %s562_s16), 63  ;;  %vm331_vm0 = vcmask 654336  }
   0xc   : > { %383 = vmatpush.bf16.msra.mxu0 %v688_v0  ;;  %689 = vmatpush.bf16.msra.mxu1 %v688_v0  ;;  %v685_v3 = vld [vmem:[%s883_s1 + $0x8] sm:$0xff]  ;;  %s563_s23 = sshll.u32 %s887_s16, 2  ;;  %v684_v4 = vld [vmem:[%s883_s1] sm:$0xff]  ;;  %s565_s29 = sshll.u32 %s887_s16, 3 }
   0xd   : > { %690 = vmatpush.bf16.msra.mxu2 %v688_v0  ;;  %691 = vmatpush.bf16.msra.mxu3 %v688_v0  ;;  %s770_s28 = scalar_lea.vmem %s882_s0, %s563_s23  ;;  %v808_v21 = vld [vmem:[%s884_s2] ss:$0 sm:$0xff]  ;;  %s813_s7 = scalar_lea.vmem %s885_s3, %s565_s29 }
   0xe   : > { %v668_v5 = vld [vmem:[%s770_s28] sm:$0xff]  ;;  %v669_v9 = vld [vmem:[%s770_s28 + $0x8] sm:$0xff]  ;;  %v670_v13 = vld [vmem:[%s770_s28 + $0x10] sm:$0xff] }
   0xf   : > { %v672_v6 = vld [vmem:[%s770_s28 + $0x20] sm:$0xff]  ;;  %v673_v10 = vld [vmem:[%s770_s28 + $0x28] sm:$0xff]  ;;  %v674_v14 = vld [vmem:[%s770_s28 + $0x30] sm:$0xff] }
  0x10   : > { %384 = vmatpush.bf16.msra.mxu0 %v687_v1  ;;  %692 = vmatpush.bf16.msra.mxu1 %v687_v1  ;;  %v676_v7 = vld [vmem:[%s770_s28 + $0x40] sm:$0xff]  ;;  %v677_v11 = vld [vmem:[%s770_s28 + $0x48] sm:$0xff]  ;;  %v678_v15 = vld [vmem:[%s770_s28 + $0x50] sm:$0xff] }
  0x11   : > { %693 = vmatpush.bf16.msra.mxu2 %v687_v1  ;;  %694 = vmatpush.bf16.msra.mxu3 %v687_v1  ;;  %v680_v8 = vld [vmem:[%s770_s28 + $0x60] sm:$0xff]  ;;  %v681_v12 = vld [vmem:[%s770_s28 + $0x68] sm:$0xff]  ;;  %v682_v16 = vld [vmem:[%s770_s28 + $0x70] sm:$0xff] }
  0x12   : > { %v671_v17 = vld [vmem:[%s770_s28 + $0x18] sm:$0xff] }
  0x13   : > { %v675_v18 = vld [vmem:[%s770_s28 + $0x38] sm:$0xff] }
  0x14   : > { %385 = vmatpush.bf16.msra.mxu0 %v686_v2  ;;  %695 = vmatpush.bf16.msra.mxu1 %v686_v2  ;;  %v679_v19 = vld [vmem:[%s770_s28 + $0x58] sm:$0xff] }
  0x15   : > { %696 = vmatpush.bf16.msra.mxu2 %v686_v2  ;;  %697 = vmatpush.bf16.msra.mxu3 %v686_v2  ;;  %v683_v20 = vld [vmem:[%s770_s28 + $0x78] sm:$0xff] }
  0x18   : > { %386 = vmatpush.bf16.msra.mxu0 %v685_v3  ;;  %698 = vmatpush.bf16.msra.mxu1 %v685_v3 }
  0x19   : > { %699 = vmatpush.bf16.msra.mxu2 %v685_v3  ;;  %700 = vmatpush.bf16.msra.mxu3 %v685_v3 }
  0x1c   : > { %387 = vmatpush.bf16.msra.mxu0 %v684_v4  ;;  %701 = vmatpush.bf16.msra.mxu1 %v684_v4 }
  0x1d   : > { %702 = vmatpush.bf16.msra.mxu2 %v684_v4  ;;  %703 = vmatpush.bf16.msra.mxu3 %v684_v4 }
  0x1f   : > { %650 = vmatmul.msk.bf16.vlgmr.msra.gmra.mxu0 %vm331_vm0, %v668_v5  ;;  %654 = vmatmul.msk.bf16.vlgmr.msra.gmra.mxu1 %vm331_vm0, %v672_v6 }
  0x20   : > { %658 = vmatmul.msk.bf16.vlgmr.msra.gmra.mxu2 %vm331_vm0, %v676_v7  ;;  %662 = vmatmul.msk.bf16.vlgmr.msra.gmra.mxu3 %vm331_vm0, %v680_v8 }
  0x2f   : > { %651 = vmatmul.msk.bf16.gmra.mxu0 %vm331_vm0, %v669_v9  ;;  %655 = vmatmul.msk.bf16.gmra.mxu1 %vm331_vm0, %v673_v10 }
  0x30   : > { %659 = vmatmul.msk.bf16.gmra.mxu2 %vm331_vm0, %v677_v11  ;;  %663 = vmatmul.msk.bf16.gmra.mxu3 %vm331_vm0, %v681_v12 }
  0x3f   : > { %652 = vmatmul.msk.bf16.gmra.mxu0 %vm331_vm0, %v670_v13  ;;  %656 = vmatmul.msk.bf16.gmra.mxu1 %vm331_vm0, %v674_v14 }
  0x40   : > { %660 = vmatmul.msk.bf16.gmra.mxu2 %vm331_vm0, %v678_v15  ;;  %664 = vmatmul.msk.bf16.gmra.mxu3 %vm331_vm0, %v682_v16 }
  0x4f   : > { %653 = vmatmul.msk.bf16.gmra.mxu0 %vm331_vm0, %v671_v17  ;;  %657 = vmatmul.msk.bf16.gmra.mxu1 %vm331_vm0, %v675_v18 }
  0x50   : > { %661 = vmatmul.msk.bf16.gmra.mxu2 %vm331_vm0, %v679_v19  ;;  %665 = vmatmul.msk.bf16.gmra.mxu3 %vm331_vm0, %v683_v20 }
  0x9c   : > { %v389_v22 = vpop.f32.mrf.mxu0  ;;  %v409_v23 = vpop.f32.mrf.mxu1 }
  0x9d   : > { %v390_v24 = vadd.f32 %v808_v21, %v389_v22  ;;  %v410_v25 = vadd.f32 %v808_v21, %v409_v23 }
  0x9f   : > { %469 = vst [vmem:[%s813_s7] sm:$0xff] %v390_v24 }
  0xa0   : > { %477 = vst [vmem:[%s813_s7 + $0x40] sm:$0xff] %v410_v25 }
  0xa3   : > { %v429_v26 = vpop.f32.mrf.mxu2  ;;  %v449_v27 = vpop.f32.mrf.mxu3 }
  0xa4   : > { %v430_v28 = vadd.f32 %v808_v21, %v429_v26  ;;  %v450_v29 = vadd.f32 %v808_v21, %v449_v27  ;;  %v391_v30 = vpop.f32.mrf.mxu0  ;;  %v411_v31 = vpop.f32.mrf.mxu1 }
  0xa5   : > { %v392_v32 = vadd.f32 %v808_v21, %v391_v30  ;;  %v412_v33 = vadd.f32 %v808_v21, %v411_v31 }
  0xa6   : > { %485 = vst [vmem:[%s813_s7 + $0x80] sm:$0xff] %v430_v28 }
  0xa7   : > { %493 = vst [vmem:[%s813_s7 + $0xc0] sm:$0xff] %v450_v29 }
  0xa8   : > { %470 = vst [vmem:[%s813_s7 + $0x8] sm:$0xff] %v392_v32 }
  0xa9   : > { %478 = vst [vmem:[%s813_s7 + $0x48] sm:$0xff] %v412_v33 }
  0xab   : > { %v431_v34 = vpop.f32.mrf.mxu2  ;;  %v451_v35 = vpop.f32.mrf.mxu3 }
  0xac   : > { %v432_v36 = vadd.f32 %v808_v21, %v431_v34  ;;  %v452_v37 = vadd.f32 %v808_v21, %v451_v35  ;;  %v394_v38 = vpop.f32.mrf.mxu0  ;;  %v414_v39 = vpop.f32.mrf.mxu1 }
  0xad   : > { %v395_v40 = vadd.f32 %v808_v21, %v394_v38  ;;  %v415_v41 = vadd.f32 %v808_v21, %v414_v39 }
  0xae   : > { %486 = vst [vmem:[%s813_s7 + $0x88] sm:$0xff] %v432_v36 }
  0xaf   : > { %494 = vst [vmem:[%s813_s7 + $0xc8] sm:$0xff] %v452_v37 }
  0xb0   : > { %471 = vst [vmem:[%s813_s7 + $0x10] sm:$0xff] %v395_v40 }
  0xb1   : > { %479 = vst [vmem:[%s813_s7 + $0x50] sm:$0xff] %v415_v41 }
  0xb3   : > { %v434_v42 = vpop.f32.mrf.mxu2  ;;  %v454_v43 = vpop.f32.mrf.mxu3 }
  0xb4   : > { %v435_v44 = vadd.f32 %v808_v21, %v434_v42  ;;  %v455_v45 = vadd.f32 %v808_v21, %v454_v43  ;;  %v396_v46 = vpop.f32.mrf.mxu0  ;;  %v416_v47 = vpop.f32.mrf.mxu1 }
  0xb5   : > { %v397_v48 = vadd.f32 %v808_v21, %v396_v46  ;;  %v417_v49 = vadd.f32 %v808_v21, %v416_v47 }
  0xb6   : > { %487 = vst [vmem:[%s813_s7 + $0x90] sm:$0xff] %v435_v44 }
  0xb7   : > { %495 = vst [vmem:[%s813_s7 + $0xd0] sm:$0xff] %v455_v45 }
  0xb8   : > { %472 = vst [vmem:[%s813_s7 + $0x18] sm:$0xff] %v397_v48 }
  0xb9   : > { %480 = vst [vmem:[%s813_s7 + $0x58] sm:$0xff] %v417_v49 }
  0xbb   : > { %v436_v50 = vpop.f32.mrf.mxu2  ;;  %v456_v51 = vpop.f32.mrf.mxu3 }
  0xbc   : > { %v437_v52 = vadd.f32 %v808_v21, %v436_v50  ;;  %v457_v53 = vadd.f32 %v808_v21, %v456_v51  ;;  %v399_v54 = vpop.f32.mrf.mxu0  ;;  %v419_v55 = vpop.f32.mrf.mxu1 }
  0xbd   : > { %v400_v56 = vadd.f32 %v808_v21, %v399_v54  ;;  %v420_v57 = vadd.f32 %v808_v21, %v419_v55 }
  0xbe   : > { %488 = vst [vmem:[%s813_s7 + $0x98] sm:$0xff] %v437_v52 }
  0xbf   : > { %496 = vst [vmem:[%s813_s7 + $0xd8] sm:$0xff] %v457_v53 }
  0xc0   : > { %473 = vst [vmem:[%s813_s7 + $0x20] sm:$0xff] %v400_v56 }
  0xc1   : > { %481 = vst [vmem:[%s813_s7 + $0x60] sm:$0xff] %v420_v57 }
  0xc3   : > { %v439_v58 = vpop.f32.mrf.mxu2  ;;  %v459_v59 = vpop.f32.mrf.mxu3 }
  0xc4   : > { %v440_v60 = vadd.f32 %v808_v21, %v439_v58  ;;  %v460_v61 = vadd.f32 %v808_v21, %v459_v59  ;;  %v401_v62 = vpop.f32.mrf.mxu0  ;;  %v421_v63 = vpop.f32.mrf.mxu1 }
  0xc5   : > { %v402_v0 = vadd.f32 %v808_v21, %v401_v62  ;;  %v422_v1 = vadd.f32 %v808_v21, %v421_v63 }
  0xc6   : > { %489 = vst [vmem:[%s813_s7 + $0xa0] sm:$0xff] %v440_v60 }
  0xc7   : > { %497 = vst [vmem:[%s813_s7 + $0xe0] sm:$0xff] %v460_v61 }
  0xc8   : > { %474 = vst [vmem:[%s813_s7 + $0x28] sm:$0xff] %v402_v0 }
  0xc9   : > { %482 = vst [vmem:[%s813_s7 + $0x68] sm:$0xff] %v422_v1 }
  0xcb   : > { %v441_v2 = vpop.f32.mrf.mxu2  ;;  %v461_v3 = vpop.f32.mrf.mxu3 }
  0xcc   : > { %v442_v4 = vadd.f32 %v808_v21, %v441_v2  ;;  %v462_v5 = vadd.f32 %v808_v21, %v461_v3  ;;  %v404_v6 = vpop.f32.mrf.mxu0  ;;  %v424_v7 = vpop.f32.mrf.mxu1 }
  0xcd   : > { %v405_v8 = vadd.f32 %v808_v21, %v404_v6  ;;  %v425_v9 = vadd.f32 %v808_v21, %v424_v7 }
  0xce   : > { %490 = vst [vmem:[%s813_s7 + $0xa8] sm:$0xff] %v442_v4 }
  0xcf   : > { %498 = vst [vmem:[%s813_s7 + $0xe8] sm:$0xff] %v462_v5 }
  0xd0   : > { %475 = vst [vmem:[%s813_s7 + $0x30] sm:$0xff] %v405_v8 }
  0xd1   : > { %483 = vst [vmem:[%s813_s7 + $0x70] sm:$0xff] %v425_v9 }
  0xd3   : > { %v444_v10 = vpop.f32.mrf.mxu2  ;;  %v464_v11 = vpop.f32.mrf.mxu3 }
  0xd4   : > { %v445_v12 = vadd.f32 %v808_v21, %v444_v10  ;;  %v465_v13 = vadd.f32 %v808_v21, %v464_v11  ;;  %v406_v14 = vpop.f32.mrf.mxu0  ;;  %v426_v15 = vpop.f32.mrf.mxu1 }
  0xd5   : > { %v407_v16 = vadd.f32 %v808_v21, %v406_v14  ;;  %v427_v17 = vadd.f32 %v808_v21, %v426_v15 }
  0xd6   : > { %491 = vst [vmem:[%s813_s7 + $0xb0] sm:$0xff] %v445_v12 }
  0xd7   : > { %499 = vst [vmem:[%s813_s7 + $0xf0] sm:$0xff] %v465_v13 }
  0xd8   : > { %476 = vst [vmem:[%s813_s7 + $0x38] sm:$0xff] %v407_v16 }
  0xd9   : > { %484 = vst [vmem:[%s813_s7 + $0x78] sm:$0xff] %v427_v17 }
  0xdb   : > { %v446_v18 = vpop.f32.mrf.mxu2  ;;  %v466_v19 = vpop.f32.mrf.mxu3 }
  0xdc   : > { %v447_v20 = vadd.f32 %v808_v21, %v446_v18  ;;  %v467_v22 = vadd.f32 %v808_v21, %v466_v19 }
  0xde   : > { %492 = vst [vmem:[%s813_s7 + $0xb8] sm:$0xff] %v447_v20 }
  0xdf   : > { %500 = vst [vmem:[%s813_s7 + $0xf8] sm:$0xff] %v467_v22 }
  0xe0 PF: > { %s13_s12 = sadd.s32 1, %s719_s12  }
  0xe1   : > { %p10_p4 = scmp.ge.s32.totalorder %s13_s12, 4  }
  0xe3   :  { %12 = sbr.rel (!%p10_p4) target bundleno = 1 (0x1), region = 62 }

</bundles_post_ra>
